<compile_context>
chip_gen: v7x
topology: tpu7x:2x2x1
jax: 0.10.0
libtpu: 0.0.40
codegen_flags: <defaults>
</compile_context>

<pallas_src>
import functools

import jax
import jax.numpy as jnp
from jax.experimental import pallas as pl
from jax.experimental.pallas import tpu as pltpu

INPUT_DIM = 100
HIDDEN_DIM = 50
OUTPUT_DIM = 10


def _cdiv(a, b):
    return (a + b - 1) // b


def _round_up(n, m):
    return ((n + m - 1) // m) * m


def simplenet_kernel(x_ref, w1_ref, b1_ref, w2_ref, b2_ref, o_ref):
    # fc1: (tb, 100) @ (100, 50) + (1, 50), then ReLU.  MXU handles the
    # non-128-aligned K/N internally; everything here is VMEM-resident.
    h = jnp.dot(x_ref[...], w1_ref[...], preferred_element_type=jnp.float32)
    h = jnp.maximum(h + b1_ref[...], 0.0)
    # fc2: (tb, 50) @ (50, 10) + (1, 10).
    y = jnp.dot(h, w2_ref[...], preferred_element_type=jnp.float32)
    o_ref[...] = (y + b2_ref[...]).astype(o_ref.dtype)


@functools.partial(jax.jit, static_argnames=("block_batch",))
def simplenet_forward(x, w1, b1, w2, b2, *, block_batch=4096):
    """Fused fc1 -> ReLU -> fc2.

    x : (B, INPUT_DIM)
    w1: (INPUT_DIM, HIDDEN_DIM)   (transposed vs. torch nn.Linear storage)
    b1: (HIDDEN_DIM,) or (1, HIDDEN_DIM)
    w2: (HIDDEN_DIM, OUTPUT_DIM)
    b2: (OUTPUT_DIM,) or (1, OUTPUT_DIM)
    returns (B, OUTPUT_DIM)
    """
    B = x.shape[0]
    dtype = x.dtype
    b1 = b1.reshape(1, HIDDEN_DIM)
    b2 = b2.reshape(1, OUTPUT_DIM)

    # Tile sizing: minimize batch padding (waste < 8 rows per tile) and aim
    # for >= 4 grid steps when B allows (v7x shards the "parallel" batch axis
    # across its 2 TensorCores; v5e/v6e are unaffected).
    n_tiles = max(_cdiv(B, block_batch), min(4, _cdiv(B, 8)))
    tb = _round_up(_cdiv(B, n_tiles), 8)
    b_pad = n_tiles * tb

    # Batch-only padding, and only when actually required.
    xb = x if b_pad == B else jnp.pad(x, ((0, b_pad - B), (0, 0)))

    flops = 2 * b_pad * (INPUT_DIM * HIDDEN_DIM + HIDDEN_DIM * OUTPUT_DIM)
    bytes_accessed = 4 * (
        b_pad * (INPUT_DIM + OUTPUT_DIM)
        + INPUT_DIM * HIDDEN_DIM + HIDDEN_DIM
        + HIDDEN_DIM * OUTPUT_DIM + OUTPUT_DIM
    )

    out = pl.pallas_call(
        simplenet_kernel,
        out_shape=jax.ShapeDtypeStruct((b_pad, OUTPUT_DIM), dtype),
        grid=(n_tiles,),
        in_specs=[
            # x: tiled over batch, pipelined/double-buffered; native 100-wide
            # last dim (block last dim == full array dim).
            pl.BlockSpec((tb, INPUT_DIM), lambda i: (i, 0)),
            # Weights & biases: whole-array blocks, resident across the grid.
            pl.BlockSpec((INPUT_DIM, HIDDEN_DIM), lambda i: (0, 0)),
            pl.BlockSpec((1, HIDDEN_DIM), lambda i: (0, 0)),
            pl.BlockSpec((HIDDEN_DIM, OUTPUT_DIM), lambda i: (0, 0)),
            pl.BlockSpec((1, OUTPUT_DIM), lambda i: (0, 0)),
        ],
        # Output written directly at its real 10-column width: ~13x less HBM
        # writeback than the previous 128-wide padded slab.
        out_specs=pl.BlockSpec((tb, OUTPUT_DIM), lambda i: (i, 0)),
        compiler_params=pltpu.CompilerParams(
            dimension_semantics=("parallel",),
        ),
        cost_estimate=pl.CostEstimate(
            flops=flops, transcendentals=0, bytes_accessed=bytes_accessed
        ),
    )(xb, w1, b1, w2, b2)

    return out if b_pad == B else out[:B]


def init_params(key):
    """Deterministic init mimicking nn.Linear default (uniform +/- 1/sqrt(fan_in))."""
    k1, k2, k3, k4 = jax.random.split(key, 4)
    bound1 = 1.0 / (INPUT_DIM ** 0.5)
    bound2 = 1.0 / (HIDDEN_DIM ** 0.5)
    # Stored already transposed: (in_features, out_features).
    w1 = jax.random.uniform(k1, (INPUT_DIM, HIDDEN_DIM), jnp.float32,
                            -bound1, bound1)
    b1 = jax.random.uniform(k2, (1, HIDDEN_DIM), jnp.float32, -bound1, bound1)
    w2 = jax.random.uniform(k3, (HIDDEN_DIM, OUTPUT_DIM), jnp.float32,
                            -bound2, bound2)
    b2 = jax.random.uniform(k4, (1, OUTPUT_DIM), jnp.float32, -bound2, bound2)
    return w1, b1, w2, b2


def reference_forward(x, w1, b1, w2, b2):
    h = jnp.maximum(x @ w1 + b1.reshape(1, -1), 0.0)
    return h @ w2 + b2.reshape(1, -1)


if __name__ == "__main__":
    key = jax.random.PRNGKey(0)
    kx, kx2, kp = jax.random.split(key, 3)
    w1, b1, w2, b2 = init_params(kp)

    # Case 1: small, tile-aligned batch (single grid step).
    batch = 8
    x = jax.random.normal(kx, (batch, INPUT_DIM), dtype=jnp.float32)
    out = jax.block_until_ready(simplenet_forward(x, w1, b1, w2, b2))
    ref = reference_forward(x, w1, b1, w2, b2)
    assert out.shape == (batch, OUTPUT_DIM)
    assert jnp.allclose(out, ref, atol=1e-4, rtol=1e-4)

    # Case 2: ragged batch exercising batch padding + a multi-step grid.
    batch2 = 20
    x2 = jax.random.normal(kx2, (batch2, INPUT_DIM), dtype=jnp.float32)
    out2 = jax.block_until_ready(simplenet_forward(x2, w1, b1, w2, b2))
    ref2 = reference_forward(x2, w1, b1, w2, b2)
    assert out2.shape == (batch2, OUTPUT_DIM)
    assert jnp.allclose(out2, ref2, atol=1e-4, rtol=1e-4)

    print("KERNEL_OK")
</pallas_src>

<mosaic_0001>
module attributes {stable_mosaic.version = 11 : i64} {
  func.func @simplenet_kernel(%arg0: i32, %arg1: memref<8x100xf32, #tpu.memory_space<vmem>>, %arg2: memref<100x50xf32, #tpu.memory_space<vmem>>, %arg3: memref<1x50xf32, #tpu.memory_space<vmem>>, %arg4: memref<50x10xf32, #tpu.memory_space<vmem>>, %arg5: memref<1x10xf32, #tpu.memory_space<vmem>>, %arg6: memref<8x10xf32, #tpu.memory_space<vmem>>) attributes {dimension_semantics = [#tpu.dimension_semantics<parallel>], iteration_bounds = array<i64: 1>, scalar_prefetch = 0 : i64, scratch_operands = 0 : i64, tpu.core_type = #tpu.core_type<tc>, window_params = [{transform_indices = @transform_0, window_bounds = array<i64: 8, 100>}, {pipeline_mode = #tpu.pipeline_mode<synchronous>, transform_indices = @transform_1, window_bounds = array<i64: 100, 50>}, {pipeline_mode = #tpu.pipeline_mode<synchronous>, transform_indices = @transform_2, window_bounds = array<i64: 1, 50>}, {pipeline_mode = #tpu.pipeline_mode<synchronous>, transform_indices = @transform_3, window_bounds = array<i64: 50, 10>}, {pipeline_mode = #tpu.pipeline_mode<synchronous>, transform_indices = @transform_4, window_bounds = array<i64: 1, 10>}, {transform_indices = @transform_5, window_bounds = array<i64: 8, 10>}]} {
    %c0 = arith.constant 0 : index
    %c0_0 = arith.constant 0 : index
    %0 = vector.load %arg1[%c0, %c0_0] : memref<8x100xf32, #tpu.memory_space<vmem>>, vector<8x100xf32>
    %c0_1 = arith.constant 0 : index
    %c0_2 = arith.constant 0 : index
    %1 = vector.load %arg2[%c0_1, %c0_2] : memref<100x50xf32, #tpu.memory_space<vmem>>, vector<100x50xf32>
    %cst = arith.constant dense<0.000000e+00> : vector<8x50xf32>
    %2 = tpu.matmul %0, %1, %cst {dimension_numbers = #tpu.dot_dimension_numbers<[1], [0], [0], [1], [0, 0, 1, 1], [], []>} : vector<8x100xf32>, vector<100x50xf32>, vector<8x50xf32> -> vector<8x50xf32>
    %c0_3 = arith.constant 0 : index
    %c0_4 = arith.constant 0 : index
    %3 = vector.load %arg3[%c0_3, %c0_4] : memref<1x50xf32, #tpu.memory_space<vmem>>, vector<1x50xf32>
    %4 = vector.broadcast %3 : vector<1x50xf32> to vector<8x50xf32>
    %5 = arith.addf %2, %4 : vector<8x50xf32>
    %cst_5 = arith.constant 0.000000e+00 : f32
    %6 = vector.broadcast %cst_5 : f32 to vector<8x50xf32>
    %7 = arith.maximumf %5, %6 : vector<8x50xf32>
    %c0_6 = arith.constant 0 : index
    %c0_7 = arith.constant 0 : index
    %8 = vector.load %arg4[%c0_6, %c0_7] : memref<50x10xf32, #tpu.memory_space<vmem>>, vector<50x10xf32>
    %cst_8 = arith.constant dense<0.000000e+00> : vector<8x10xf32>
    %9 = tpu.matmul %7, %8, %cst_8 {dimension_numbers = #tpu.dot_dimension_numbers<[1], [0], [0], [1], [0, 0, 1, 1], [], []>} : vector<8x50xf32>, vector<50x10xf32>, vector<8x10xf32> -> vector<8x10xf32>
    %c0_9 = arith.constant 0 : index
    %c0_10 = arith.constant 0 : index
    %10 = vector.load %arg5[%c0_9, %c0_10] : memref<1x10xf32, #tpu.memory_space<vmem>>, vector<1x10xf32>
    %11 = vector.broadcast %10 : vector<1x10xf32> to vector<8x10xf32>
    %12 = arith.addf %9, %11 : vector<8x10xf32>
    %c0_11 = arith.constant 0 : index
    %c0_12 = arith.constant 0 : index
    %13 = vector.load %arg6[%c0_11, %c0_12] : memref<8x10xf32, #tpu.memory_space<vmem>>, vector<8x10xf32>
    tpu.vector_store %arg6[%c0_11, %c0_12], %12 {strides = array<i32>} : memref<8x10xf32, #tpu.memory_space<vmem>>, vector<8x10xf32>,
    return
  }
  func.func @transform_0(%arg0: i32) -> (i32, i32) {
    %c0_i32 = arith.constant 0 : i32
    %c0_i32_0 = arith.constant 0 : i32
    return %arg0, %c0_i32 : i32, i32
  }
  func.func @transform_1(%arg0: i32) -> (i32, i32) {
    %c0_i32 = arith.constant 0 : i32
    %c0_i32_0 = arith.constant 0 : i32
    %c0_i32_1 = arith.constant 0 : i32
    return %c0_i32, %c0_i32_0 : i32, i32
  }
  func.func @transform_2(%arg0: i32) -> (i32, i32) {
    %c0_i32 = arith.constant 0 : i32
    %c0_i32_0 = arith.constant 0 : i32
    %c0_i32_1 = arith.constant 0 : i32
    return %c0_i32, %c0_i32_0 : i32, i32
  }
  func.func @transform_3(%arg0: i32) -> (i32, i32) {
    %c0_i32 = arith.constant 0 : i32
    %c0_i32_0 = arith.constant 0 : i32
    %c0_i32_1 = arith.constant 0 : i32
    return %c0_i32, %c0_i32_0 : i32, i32
  }
  func.func @transform_4(%arg0: i32) -> (i32, i32) {
    %c0_i32 = arith.constant 0 : i32
    %c0_i32_0 = arith.constant 0 : i32
    %c0_i32_1 = arith.constant 0 : i32
    return %c0_i32, %c0_i32_0 : i32, i32
  }
  func.func @transform_5(%arg0: i32) -> (i32, i32) {
    %c0_i32 = arith.constant 0 : i32
    %c0_i32_0 = arith.constant 0 : i32
    return %arg0, %c0_i32 : i32, i32
  }
}

</mosaic_0001>

<bundles_post_ra>
// kernel: simplenet_forward.1
= control target key start
LH: loop header
LB: loop body
LE: loop exit
PB: predicated region body
PF: predicated region fallthrough
CT: control target
= control target key end

     0   :  { %v358_v3 = vmov 0.0|0.0   ;;  %vm359_vm0 = vmmov 0   ;;  %v360_v6 = vmov 0.0   ;;  %s473_s0 = inlined_call_operand.vmem [shape: f32[8,100], index: 0, kind: input, shape index: {}]   ;;  %s474_s1 = inlined_call_operand.vmem [shape: f32[100,50], index: 1, kind: input, shape index: {}]   ;;  %s475_s2 = inlined_call_operand.vmem [shape: f32[1,50], index: 2, kind: input, shape index: {}]   ;;  %s476_s3 = inlined_call_operand.vmem [shape: f32[50,10], index: 3, kind: input, shape index: {}]   ;;  %s477_s4 = inlined_call_operand.vmem [shape: f32[1,10], index: 4, kind: input, shape index: {}]   ;;  %s478_s5 = inlined_call_operand.hbm [shape: f32[8,10], index: 5, kind: output, shape index: {}]  }
   0x1   :  { %v22_v0 = vld [vmem:[%s474_s1] sm:$0xff]  ;;  %v23_v1 = vld [vmem:[%s474_s1 + $0x8] sm:$0xff]  ;;  %v24_v2 = vld [vmem:[%s474_s1 + $0x10] sm:$0xff]  ;;  %303 = vmatprep.subr.bf16.mxu0 %v358_v3  ;;  %321 = vmatprep.subr.bf16.mxu1 %v358_v3 }
   0x2   :  { %v304_v4 = vpack.c.bf16 %v23_v1, %v22_v0  ;;  %v25_v5 = vld [vmem:[%s474_s1 + $0x18] sm:$0xff]  ;;  %283 = vmatprep.mubr.msk.f32.mxu0 %vm359_vm0, %v360_v6  ;;  %300 = vmatprep.mubr.msk.f32.mxu1 %vm359_vm0, %v360_v6  ;;  %v26_v8 = vld [vmem:[%s474_s1 + $0x20] sm:$0xff]  ;;  %v27_v9 = vld [vmem:[%s474_s1 + $0x28] sm:$0xff] }
   0x3   :  { %v307_v7 = vpack.c.bf16 %v25_v5, %v24_v2  ;;  %v121_v10 = vld [vmem:[%s476_s3] sm:$0xff]  ;;  %v122_v11 = vld [vmem:[%s476_s3 + $0x8] sm:$0xff]  ;;  %v123_v12 = vld [vmem:[%s476_s3 + $0x10] sm:$0xff] }
   0x4   :  { %305 = vmatpush3.bf16.msra.mxu0 %v304_v4  ;;  %v124_v13 = vld [vmem:[%s476_s3 + $0x18] sm:$0xff]  ;;  %v322_v14 = vpack.c.bf16 %v122_v11, %v121_v10 }
   0x5   :  { %306 = vmatprep.subr.bf16.mxu0 %v358_v3 }
   0x6   :  { %10 = vsyncpa [#allocation3], 0  ;;  %v310_v15 = vpack.c.bf16 %v27_v9, %v26_v8  ;;  %v28_v16 = vld [vmem:[%s474_s1 + $0x30] sm:$0xff]  ;;  %v29_v17 = vld [vmem:[%s474_s1 + $0x38] sm:$0xff]  ;;  %323 = vmatpush3.bf16.msra.mxu1 %v322_v14  ;;  %v325_v18 = vpack.c.bf16 %v124_v13, %v123_v12  ;;  %vm46_vm1 = vcmask 1043456   ;;  %vm42_vm2 = vcmask 818176  }
   0x7   :  { %324 = vmatprep.subr.bf16.mxu1 %v358_v3  ;;  %v313_v19 = vpack.c.bf16 %v29_v17, %v28_v16  ;;  %v30_v20 = vld [vmem:[%s474_s1 + $0x40] sm:$0xff]  ;;  %v31_v21 = vld [vmem:[%s474_s1 + $0x48] sm:$0xff]  ;;  %v32_v23 = vld [vmem:[%s474_s1 + $0x50] sm:$0xff]  ;;  %vm139_vm3 = vcmask 1041408   ;;  %vm135_vm4 = vcmask 408576   ;;  %s361_s12 = smov [#allocation2]  }
   0x8   :  { %308 = vmatpush3.bf16.msra.mxu0 %v307_v7  ;;  %v316_v22 = vpack.c.bf16 %v31_v21, %v30_v20  ;;  %v33_v24 = vld [vmem:[%s474_s1 + $0x58] sm:$0xff]  ;;  %v34_v26 = vld [vmem:[%s474_s1 + $0x60] sm:$0xf]  ;;  %v126_v29 = vld [vmem:[%s476_s3 + $0x28] sm:$0xff]  ;;  %s221_s13 = sshll.u32 %s361_s12, 4  ;;  %vm213_vm5 = vcmask 80896   ;;  %s222_s13 = int_to_ptr.vmem [resolvable:$true] %s221_s13 }
   0x9   :  { %309 = vmatprep.subr.bf16.mxu0 %v358_v3  ;;  %v319_v25 = vpack.c.bf16 %v33_v24, %v32_v23  ;;  %v21_v27 = vld [vmem:[%s473_s0] sm:$0xff]  ;;  %v127_v31 = vld [vmem:[%s476_s3 + $0x30] sm:$0x3]  ;;  %p339_p1 = scmp.lt.s32.totalorder %s222_s13, %s222_s13 }
   0xa   :  { %326 = vmatpush3.bf16.msra.mxu1 %v325_v18  ;;  %v125_v28 = vld [vmem:[%s476_s3 + $0x20] sm:$0xff]  ;;  %s334_s3 = scalar_lea.vmem %s222_s13, 128 }
   0xb   :  { %327 = vmatprep.subr.bf16.mxu1 %v358_v3  ;;  %v328_v30 = vpack.c.bf16 %v126_v29, %v125_v28  ;;  %v229_v32 = vld [vmem:[%s475_s2] ss:$0 sm:$0xff]  ;;  %p335_p0 = scmp.ne.s32.totalorder %s222_s13, %s334_s3  ;;  %p340_p2 = scmp.lt.s32.totalorder %s334_s3, %s334_s3 }
   0xc   :  { %311 = vmatpush3.bf16.msra.mxu0 %v310_v15  ;;  %v232_v37 = vld [vmem:[%s477_s4] ss:$0 sm:$0xff] }
   0xd   :  { %312 = vmatprep.subr.bf16.mxu0 %v358_v3  ;;  %p341_p3 = por %p340_p2, %p339_p1 }
   0xe   :  { %329 = vmatpush3.bf16.msra.mxu1 %v328_v30 }
   0xf   :  { %298 = vmatprep.subr.mxu1 %v360_v6  ;;  %p342_p4 = pnand %p341_p3, %p335_p0 }
  0x10   :  { %314 = vmatpush3.bf16.msra.mxu0 %v313_v19 }
  0x11   :  { %315 = vmatprep.subr.bf16.mxu0 %v358_v3 }
  0x12   :  { %299 = vmatpush3.msk.msra.mxu1 %vm139_vm3, %v127_v31 }
  0x14   :  { %317 = vmatpush3.bf16.msra.mxu0 %v316_v22 }
  0x15   :  { %318 = vmatprep.subr.bf16.mxu0 %v358_v3 }
  0x18   :  { %320 = vmatpush3.bf16.msra.mxu0 %v319_v25 }
  0x19   :  { %281 = vmatprep.subr.mxu0 %v360_v6 }
  0x1c   :  { %282 = vmatpush3.msk.msra.mxu0 %vm46_vm1, %v34_v26 }
  0x1d   :  { %284 = vmatmul.mubr.msk.f32.vlgmr.msra.gmra.mrb[0].mxu0 %vm42_vm2, %v21_v27 }
  0xf0   :  { %v116_v33 = vpop.f32.mrb[0].mxu0 }
  0xf1   :  { %v117_v34 = vadd.f32 %v229_v32, %v116_v33  ;;  %v285_v35 = vpop.f32.mrb[1].mxu0 }
  0xf3   :  { %v120_v36 = vmax.f32 %v117_v34, 0.0 }
  0xf5   :  { %301 = vmatmul.mubr.msk.f32.vlgmr.msra.gmra.mrb[0].mxu1 %vm135_vm4, %v120_v36 }
 0x1c8   :  { %v209_v38 = vpop.f32.mrb[0].mxu1 }
 0x1c9   :  { %v210_v39 = vadd.f32 %v232_v37, %v209_v38  ;;  %v302_v40 = vpop.f32.mrb[1].mxu1 }
 0x1cb   :  { %214 = vst.msk [vmem:[#allocation2] sm:$0xff] %vm213_vm5, %v210_v39 }
 0x1cc   :  { %345 = shalt.err (!%p342_p4)
}
 0x1cd   :  { %s346_s15 = scalar_lea.hbm %s478_s5, 128 }
 0x1ce   :  { %p347_p5 = scmp.ne.s32.totalorder %s478_s5, %s346_s15  ;;  %p350_p6 = scmp.lt.u32.totalorder %s346_s15, %s478_s5 }
 0x1d0   :  { %p352_p7 = pnand %p350_p6, %p347_p5 }
 0x1d2   :  { %355 = shalt.err (!%p352_p7)
}
 0x1d3   :  { %224 = dma.vmem_to_hbm [thread:$0]  %s222_s13, 128, %s478_s5, [#allocation3]  }
 0x1d4   :  { %356 = dma.done.wait [#allocation3], 128  }
 0x1d5   :  { %357 = vsyncadd [#allocation3], 4294967168 }
 0x1d6   :  { %228 = vsyncpa [#allocation3], 1 }

</bundles_post_ra>
